<compile_context>
chip_gen: v7x
topology: tpu7x:2x2x1
jax: 0.10.0
libtpu: 0.0.40
codegen_flags: <defaults>
</compile_context>

<pallas_src>
import jax
import jax.numpy as jnp
from jax.experimental import pallas as pl
from jax.experimental.pallas import tpu as pltpu


INPUT_DIM = 103
ENCODING_DIM = 32
HIDDEN_DIM = 64


def _round_up(x, m):
    return ((x + m - 1) // m) * m


def autoencoder_kernel(x_ref,
                       w1_ref, b1_ref,
                       w2_ref, b2_ref,
                       w3_ref, b3_ref,
                       w4_ref, b4_ref,
                       out_ref):
    """Fused 4-layer MLP (encoder + decoder) for one batch tile, all in VMEM.

    The x tile arrives f32 and is cast to bf16 in-kernel; every jnp.dot runs
    bf16 on the MXU with f32 accumulation; bias-add and ReLU are done in f32
    on the VPU.
    """
    x = x_ref[...].astype(jnp.bfloat16)  # (tile, 103)

    # encoder
    h = jnp.dot(x, w1_ref[...], preferred_element_type=jnp.float32) + b1_ref[...]
    h = jnp.maximum(h, 0.0).astype(jnp.bfloat16)
    h = jnp.dot(h, w2_ref[...], preferred_element_type=jnp.float32) + b2_ref[...]
    h = jnp.maximum(h, 0.0).astype(jnp.bfloat16)

    # decoder
    h = jnp.dot(h, w3_ref[...], preferred_element_type=jnp.float32) + b3_ref[...]
    h = jnp.maximum(h, 0.0).astype(jnp.bfloat16)
    y = jnp.dot(h, w4_ref[...], preferred_element_type=jnp.float32) + b4_ref[...]

    out_ref[...] = y.astype(out_ref.dtype)


def hyperspectral_autoencoder(x, params, *, batch_tile=4096):
    """x: (B, INPUT_DIM) float32.  params: dict of f32 weights/biases with
    weights stored as (in_features, out_features).  Returns (B, INPUT_DIM) f32."""
    B, D = x.shape
    assert D == INPUT_DIM

    # Weights in bf16 (MXU inputs), biases in f32 (VPU add).  ~50 KB total,
    # kept resident in VMEM across grid steps via a constant index_map.
    w1 = params["w1"].astype(jnp.bfloat16)
    w2 = params["w2"].astype(jnp.bfloat16)
    w3 = params["w3"].astype(jnp.bfloat16)
    w4 = params["w4"].astype(jnp.bfloat16)
    b1 = params["b1"].astype(jnp.float32)
    b2 = params["b2"].astype(jnp.float32)
    b3 = params["b3"].astype(jnp.float32)
    b4 = params["b4"].astype(jnp.float32)

    # Batch tile: large (amortizes per-step overhead), multiple of 16 (native
    # bf16 sublane packing), and capped at ~ceil(B/2) so the parallel grid has
    # at least 2 steps for v7x's two TensorCores.
    tile = min(_round_up(batch_tile, 16), _round_up(pl.cdiv(B, 2), 16))
    tile = max(tile, 16)
    grid = (pl.cdiv(B, tile),)  # ragged last block: Pallas masks the store

    full = lambda i: (0, 0)  # weights/biases: same block every step -> resident

    # VMEM budget: double-buffered in/out f32 tiles (lane-padded to 128) plus
    # in-kernel intermediate activations and a little compiler headroom.
    io_bytes = 4 * tile * 128 * 4          # 2x in + 2x out tiles (f32)
    scratch_bytes = 6 * tile * 128 * 4     # intermediate activations (worst case)
    vmem_limit = min(io_bytes + scratch_bytes + 2 * 1024 * 1024,
                     48 * 1024 * 1024)

    out = pl.pallas_call(
        autoencoder_kernel,
        out_shape=jax.ShapeDtypeStruct((B, INPUT_DIM), jnp.float32),
        grid_spec=pl.GridSpec(
            grid=grid,
            in_specs=[
                pl.BlockSpec((tile, INPUT_DIM), lambda i: (i, 0)),   # x tile
                pl.BlockSpec(w1.shape, full), pl.BlockSpec(b1.shape, full),
                pl.BlockSpec(w2.shape, full), pl.BlockSpec(b2.shape, full),
                pl.BlockSpec(w3.shape, full), pl.BlockSpec(b3.shape, full),
                pl.BlockSpec(w4.shape, full), pl.BlockSpec(b4.shape, full),
            ],
            out_specs=pl.BlockSpec((tile, INPUT_DIM), lambda i: (i, 0)),
        ),
        compiler_params=pltpu.CompilerParams(
            dimension_semantics=("parallel",),
            vmem_limit_bytes=vmem_limit),
    )(x, w1, b1, w2, b2, w3, b3, w4, b4)

    return out


def init_params(key):
    """Deterministic init mimicking PyTorch's default Linear init
    (uniform in +/- 1/sqrt(fan_in)). Weights stored as (in, out), f32."""
    dims = [
        ("w1", "b1", INPUT_DIM, HIDDEN_DIM),
        ("w2", "b2", HIDDEN_DIM, ENCODING_DIM),
        ("w3", "b3", ENCODING_DIM, HIDDEN_DIM),
        ("w4", "b4", HIDDEN_DIM, INPUT_DIM),
    ]
    params = {}
    for wname, bname, fan_in, fan_out in dims:
        key, kw, kb = jax.random.split(key, 3)
        bound = 1.0 / jnp.sqrt(jnp.float32(fan_in))
        params[wname] = jax.random.uniform(
            kw, (fan_in, fan_out), jnp.float32, -bound, bound)
        params[bname] = jax.random.uniform(
            kb, (1, fan_out), jnp.float32, -bound, bound)
    return params


def reference_forward(x, params):
    """Plain-JAX f32 reference of the same forward pass."""
    h = jnp.maximum(x @ params["w1"] + params["b1"], 0.0)
    h = jnp.maximum(h @ params["w2"] + params["b2"], 0.0)
    h = jnp.maximum(h @ params["w3"] + params["b3"], 0.0)
    return h @ params["w4"] + params["b4"]


if __name__ == "__main__":
    key = jax.random.PRNGKey(0)
    key, kx1, kx2 = jax.random.split(key, 3)
    params = init_params(key)

    # Test 1: small batch -> tile auto-shrinks, single grid step.
    batch1 = 16
    x1 = jax.random.normal(kx1, (batch1, INPUT_DIM), jnp.float32)
    out1 = jax.block_until_ready(hyperspectral_autoencoder(x1, params))
    ref1 = reference_forward(x1, params)
    assert out1.shape == (batch1, INPUT_DIM)
    # bf16 matmul inputs -> looser tolerance vs the pure-f32 reference
    assert jnp.allclose(out1, ref1, atol=5e-2, rtol=5e-2), "mismatch vs reference (16)"

    # Test 2: multi-step ragged grid (B=200, tile=64 -> 4 steps, last partial).
    batch2 = 200
    x2 = jax.random.normal(kx2, (batch2, INPUT_DIM), jnp.float32)
    out2 = jax.block_until_ready(
        hyperspectral_autoencoder(x2, params, batch_tile=64))
    ref2 = reference_forward(x2, params)
    assert out2.shape == (batch2, INPUT_DIM)
    assert jnp.allclose(out2, ref2, atol=5e-2, rtol=5e-2), "mismatch vs reference (200)"

    print("KERNEL_OK")
</pallas_src>

<mosaic_0001>
module attributes {stable_mosaic.version = 11 : i64} {
  func.func @autoencoder_kernel(%arg0: i32, %arg1: memref<16x103xf32, #tpu.memory_space<vmem>>, %arg2: memref<103x64xbf16, #tpu.memory_space<vmem>>, %arg3: memref<1x64xf32, #tpu.memory_space<vmem>>, %arg4: memref<64x32xbf16, #tpu.memory_space<vmem>>, %arg5: memref<1x32xf32, #tpu.memory_space<vmem>>, %arg6: memref<32x64xbf16, #tpu.memory_space<vmem>>, %arg7: memref<1x64xf32, #tpu.memory_space<vmem>>, %arg8: memref<64x103xbf16, #tpu.memory_space<vmem>>, %arg9: memref<1x103xf32, #tpu.memory_space<vmem>>, %arg10: memref<16x103xf32, #tpu.memory_space<vmem>>) attributes {dimension_semantics = [#tpu.dimension_semantics<parallel>], iteration_bounds = array<i64: 1>, scalar_prefetch = 0 : i64, scratch_operands = 0 : i64, tpu.core_type = #tpu.core_type<tc>, window_params = [{transform_indices = @transform_0, window_bounds = array<i64: 16, 103>}, {pipeline_mode = #tpu.pipeline_mode<synchronous>, transform_indices = @transform_1, window_bounds = array<i64: 103, 64>}, {pipeline_mode = #tpu.pipeline_mode<synchronous>, transform_indices = @transform_2, window_bounds = array<i64: 1, 64>}, {pipeline_mode = #tpu.pipeline_mode<synchronous>, transform_indices = @transform_3, window_bounds = array<i64: 64, 32>}, {pipeline_mode = #tpu.pipeline_mode<synchronous>, transform_indices = @transform_4, window_bounds = array<i64: 1, 32>}, {pipeline_mode = #tpu.pipeline_mode<synchronous>, transform_indices = @transform_5, window_bounds = array<i64: 32, 64>}, {pipeline_mode = #tpu.pipeline_mode<synchronous>, transform_indices = @transform_6, window_bounds = array<i64: 1, 64>}, {pipeline_mode = #tpu.pipeline_mode<synchronous>, transform_indices = @transform_7, window_bounds = array<i64: 64, 103>}, {pipeline_mode = #tpu.pipeline_mode<synchronous>, transform_indices = @transform_8, window_bounds = array<i64: 1, 103>}, {transform_indices = @transform_9, window_bounds = array<i64: 16, 103>}]} {
    %c0 = arith.constant 0 : index
    %c0_0 = arith.constant 0 : index
    %0 = vector.load %arg1[%c0, %c0_0] : memref<16x103xf32, #tpu.memory_space<vmem>>, vector<16x103xf32>
    %1 = arith.truncf %0 : vector<16x103xf32> to vector<16x103xbf16>
    %c0_1 = arith.constant 0 : index
    %c0_2 = arith.constant 0 : index
    %2 = vector.load %arg2[%c0_1, %c0_2] : memref<103x64xbf16, #tpu.memory_space<vmem>>, vector<103x64xbf16>
    %cst = arith.constant dense<0.000000e+00> : vector<16x64xf32>
    %3 = tpu.matmul %1, %2, %cst {dimension_numbers = #tpu.dot_dimension_numbers<[1], [0], [0], [1], [0, 0, 1, 1], [], []>} : vector<16x103xbf16>, vector<103x64xbf16>, vector<16x64xf32> -> vector<16x64xf32>
    %c0_3 = arith.constant 0 : index
    %c0_4 = arith.constant 0 : index
    %4 = vector.load %arg3[%c0_3, %c0_4] : memref<1x64xf32, #tpu.memory_space<vmem>>, vector<1x64xf32>
    %5 = vector.broadcast %4 : vector<1x64xf32> to vector<16x64xf32>
    %6 = arith.addf %3, %5 : vector<16x64xf32>
    %cst_5 = arith.constant 0.000000e+00 : f32
    %7 = vector.broadcast %cst_5 : f32 to vector<16x64xf32>
    %8 = arith.maximumf %6, %7 : vector<16x64xf32>
    %9 = arith.truncf %8 : vector<16x64xf32> to vector<16x64xbf16>
    %c0_6 = arith.constant 0 : index
    %c0_7 = arith.constant 0 : index
    %10 = vector.load %arg4[%c0_6, %c0_7] : memref<64x32xbf16, #tpu.memory_space<vmem>>, vector<64x32xbf16>
    %cst_8 = arith.constant dense<0.000000e+00> : vector<16x32xf32>
    %11 = tpu.matmul %9, %10, %cst_8 {dimension_numbers = #tpu.dot_dimension_numbers<[1], [0], [0], [1], [0, 0, 1, 1], [], []>} : vector<16x64xbf16>, vector<64x32xbf16>, vector<16x32xf32> -> vector<16x32xf32>
    %c0_9 = arith.constant 0 : index
    %c0_10 = arith.constant 0 : index
    %12 = vector.load %arg5[%c0_9, %c0_10] : memref<1x32xf32, #tpu.memory_space<vmem>>, vector<1x32xf32>
    %13 = vector.broadcast %12 : vector<1x32xf32> to vector<16x32xf32>
    %14 = arith.addf %11, %13 : vector<16x32xf32>
    %cst_11 = arith.constant 0.000000e+00 : f32
    %15 = vector.broadcast %cst_11 : f32 to vector<16x32xf32>
    %16 = arith.maximumf %14, %15 : vector<16x32xf32>
    %17 = arith.truncf %16 : vector<16x32xf32> to vector<16x32xbf16>
    %c0_12 = arith.constant 0 : index
    %c0_13 = arith.constant 0 : index
    %18 = vector.load %arg6[%c0_12, %c0_13] : memref<32x64xbf16, #tpu.memory_space<vmem>>, vector<32x64xbf16>
    %cst_14 = arith.constant dense<0.000000e+00> : vector<16x64xf32>
    %19 = tpu.matmul %17, %18, %cst_14 {dimension_numbers = #tpu.dot_dimension_numbers<[1], [0], [0], [1], [0, 0, 1, 1], [], []>} : vector<16x32xbf16>, vector<32x64xbf16>, vector<16x64xf32> -> vector<16x64xf32>
    %c0_15 = arith.constant 0 : index
    %c0_16 = arith.constant 0 : index
    %20 = vector.load %arg7[%c0_15, %c0_16] : memref<1x64xf32, #tpu.memory_space<vmem>>, vector<1x64xf32>
    %21 = vector.broadcast %20 : vector<1x64xf32> to vector<16x64xf32>
    %22 = arith.addf %19, %21 : vector<16x64xf32>
    %cst_17 = arith.constant 0.000000e+00 : f32
    %23 = vector.broadcast %cst_17 : f32 to vector<16x64xf32>
    %24 = arith.maximumf %22, %23 : vector<16x64xf32>
    %25 = arith.truncf %24 : vector<16x64xf32> to vector<16x64xbf16>
    %c0_18 = arith.constant 0 : index
    %c0_19 = arith.constant 0 : index
    %26 = vector.load %arg8[%c0_18, %c0_19] : memref<64x103xbf16, #tpu.memory_space<vmem>>, vector<64x103xbf16>
    %cst_20 = arith.constant dense<0.000000e+00> : vector<16x103xf32>
    %27 = tpu.matmul %25, %26, %cst_20 {dimension_numbers = #tpu.dot_dimension_numbers<[1], [0], [0], [1], [0, 0, 1, 1], [], []>} : vector<16x64xbf16>, vector<64x103xbf16>, vector<16x103xf32> -> vector<16x103xf32>
    %c0_21 = arith.constant 0 : index
    %c0_22 = arith.constant 0 : index
    %28 = vector.load %arg9[%c0_21, %c0_22] : memref<1x103xf32, #tpu.memory_space<vmem>>, vector<1x103xf32>
    %29 = vector.broadcast %28 : vector<1x103xf32> to vector<16x103xf32>
    %30 = arith.addf %27, %29 : vector<16x103xf32>
    %c0_23 = arith.constant 0 : index
    %c0_24 = arith.constant 0 : index
    %31 = vector.load %arg10[%c0_23, %c0_24] : memref<16x103xf32, #tpu.memory_space<vmem>>, vector<16x103xf32>
    tpu.vector_store %arg10[%c0_23, %c0_24], %30 {strides = array<i32>} : memref<16x103xf32, #tpu.memory_space<vmem>>, vector<16x103xf32>,
    return
  }
  func.func @transform_0(%arg0: i32) -> (i32, i32) {
    %c0_i32 = arith.constant 0 : i32
    %c0_i32_0 = arith.constant 0 : i32
    return %arg0, %c0_i32 : i32, i32
  }
  func.func @transform_1(%arg0: i32) -> (i32, i32) {
    %c0_i32 = arith.constant 0 : i32
    %c0_i32_0 = arith.constant 0 : i32
    %c0_i32_1 = arith.constant 0 : i32
    return %c0_i32, %c0_i32_0 : i32, i32
  }
  func.func @transform_2(%arg0: i32) -> (i32, i32) {
    %c0_i32 = arith.constant 0 : i32
    %c0_i32_0 = arith.constant 0 : i32
    %c0_i32_1 = arith.constant 0 : i32
    return %c0_i32, %c0_i32_0 : i32, i32
  }
  func.func @transform_3(%arg0: i32) -> (i32, i32) {
    %c0_i32 = arith.constant 0 : i32
    %c0_i32_0 = arith.constant 0 : i32
    %c0_i32_1 = arith.constant 0 : i32
    return %c0_i32, %c0_i32_0 : i32, i32
  }
  func.func @transform_4(%arg0: i32) -> (i32, i32) {
    %c0_i32 = arith.constant 0 : i32
    %c0_i32_0 = arith.constant 0 : i32
    %c0_i32_1 = arith.constant 0 : i32
    return %c0_i32, %c0_i32_0 : i32, i32
  }
  func.func @transform_5(%arg0: i32) -> (i32, i32) {
    %c0_i32 = arith.constant 0 : i32
    %c0_i32_0 = arith.constant 0 : i32
    %c0_i32_1 = arith.constant 0 : i32
    return %c0_i32, %c0_i32_0 : i32, i32
  }
  func.func @transform_6(%arg0: i32) -> (i32, i32) {
    %c0_i32 = arith.constant 0 : i32
    %c0_i32_0 = arith.constant 0 : i32
    %c0_i32_1 = arith.constant 0 : i32
    return %c0_i32, %c0_i32_0 : i32, i32
  }
  func.func @transform_7(%arg0: i32) -> (i32, i32) {
    %c0_i32 = arith.constant 0 : i32
    %c0_i32_0 = arith.constant 0 : i32
    %c0_i32_1 = arith.constant 0 : i32
    return %c0_i32, %c0_i32_0 : i32, i32
  }
  func.func @transform_8(%arg0: i32) -> (i32, i32) {
    %c0_i32 = arith.constant 0 : i32
    %c0_i32_0 = arith.constant 0 : i32
    %c0_i32_1 = arith.constant 0 : i32
    return %c0_i32, %c0_i32_0 : i32, i32
  }
  func.func @transform_9(%arg0: i32) -> (i32, i32) {
    %c0_i32 = arith.constant 0 : i32
    %c0_i32_0 = arith.constant 0 : i32
    return %arg0, %c0_i32 : i32, i32
  }
}

</mosaic_0001>

<bundles_post_ra>
// kernel: tpu_custom_call.1
= control target key start
LH: loop header
LB: loop body
LE: loop exit
PB: predicated region body
PF: predicated region fallthrough
CT: control target
= control target key end

     0   :  { %v553_v1 = vmov 0.0   ;;  %vm554_vm0 = vmmov 0   ;;  %vm100_vm1 = vcmask 1042432   ;;  %s720_s0 = inlined_call_operand.vmem [shape: f32[16,103], index: 0, kind: input, shape index: {}]   ;;  %s721_s1 = inlined_call_operand.vmem [shape: bf16[103,64], index: 1, kind: input, shape index: {}]   ;;  %s722_s2 = inlined_call_operand.vmem [shape: f32[1,64], index: 2, kind: input, shape index: {}]   ;;  %s723_s3 = inlined_call_operand.vmem [shape: bf16[64,32], index: 3, kind: input, shape index: {}]   ;;  %s724_s4 = inlined_call_operand.vmem [shape: f32[1,32], index: 4, kind: input, shape index: {}]   ;;  %s725_s5 = inlined_call_operand.vmem [shape: bf16[32,64], index: 5, kind: input, shape index: {}]   ;;  %s726_s6 = inlined_call_operand.vmem [shape: f32[1,64], index: 6, kind: input, shape index: {}]   ;;  %s727_s7 = inlined_call_operand.vmem [shape: bf16[64,103], index: 7, kind: input, shape index: {}]   ;;  %s728_s8 = inlined_call_operand.vmem [shape: f32[1,103], index: 8, kind: input, shape index: {}]   ;;  %s729_s9 = inlined_call_operand.hbm [shape: f32[16,103], index: 9, kind: output, shape index: {}]  }
   0x1   :  { %v512_v0 = vld [vmem:[%s721_s1] sm:$0xff]   ;;  %456 = vmatprep.subr.bf16.mxu0 %v553_v1  ;;  %474 = vmatprep.subr.bf16.mxu1 %v553_v1  ;;  %v513_v2 = vld [vmem:[%s721_s1 + $0x8] sm:$0xff]   ;;  %v514_v3 = vld [vmem:[%s721_s1 + $0x10] sm:$0xff]  }
   0x2   :  { %457 = vmatpush3.bf16.msra.mxu0 %v512_v0  ;;  %470 = vmatprep.mubr.msk.bf16.mxu0 %vm554_vm0, %v553_v1  ;;  %v519_v4 = vld [vmem:[%s723_s3] sm:$0xff]   ;;  %v515_v5 = vld [vmem:[%s721_s1 + $0x18] sm:$0xff]   ;;  %v520_v6 = vld [vmem:[%s723_s3 + $0x8] sm:$0xff]  }
   0x3   :  { %458 = vmatprep.subr.bf16.mxu0 %v553_v1  ;;  %482 = vmatprep.mubr.msk.bf16.mxu1 %vm554_vm0, %v553_v1  ;;  %v516_v7 = vld [vmem:[%s721_s1 + $0x20] sm:$0xff]  }
   0x4   :  { %475 = vmatpush3.bf16.msra.mxu1 %v519_v4 }
   0x5   :  { %476 = vmatprep.subr.bf16.mxu1 %v553_v1 }
   0x6   :  { %459 = vmatpush3.bf16.msra.mxu0 %v513_v2 }
   0x7   :  { %460 = vmatprep.subr.bf16.mxu0 %v553_v1 }
   0x8   :  { %477 = vmatpush3.bf16.msra.mxu1 %v520_v6 }
   0x9   :  { %478 = vmatprep.subr.bf16.mxu1 %v553_v1 }
   0xa   :  { %461 = vmatpush3.bf16.msra.mxu0 %v514_v3 }
   0xb   :  { %462 = vmatprep.subr.bf16.mxu0 %v553_v1 }
   0xe   :  { %463 = vmatpush3.bf16.msra.mxu0 %v515_v5 }
   0xf   :  { %464 = vmatprep.subr.bf16.mxu0 %v553_v1 }
  0x10   :  { %14 = vsyncpa [#allocation3], 0  ;;  %vm101_vm2 = vcmask 1043456   ;;  %v555_v8 = vmov 65535   ;;  %v517_v10 = vld [vmem:[%s721_s1 + $0x28] sm:$0xff]   ;;  %v34_v14 = vld [vmem:[%s720_s0] sm:$0xff] }
  0x11   :  { %v102_v9 = vsel %vm100_vm1, 4294967295, %v555_v8  ;;  %v518_v11 = vld [vmem:[%s721_s1 + $0x30] ss:$0 sps:$4 sm:$0xff]   ;;  %v35_v15 = vld [vmem:[%s720_s0 + $0x8] sm:$0xff]  ;;  %vm96_vm3 = vcmask 842752   ;;  %v522_v18 = vld [vmem:[%s723_s3 + $0x18] sm:$0xff]  }
  0x12   :  { %465 = vmatpush3.bf16.msra.mxu0 %v516_v7  ;;  %v103_v12 = vsel %vm101_vm2, %v102_v9, 0  ;;  %v36_v16 = vpack.c.bf16 %v35_v15, %v34_v14  ;;  %v521_v17 = vld [vmem:[%s723_s3 + $0x10] sm:$0xff]   ;;  %v410_v19 = vld [vmem:[%s722_s2] ss:$0 sm:$0xff]  ;;  %vm190_vm4 = vcmask 523264   ;;  %v524_v30 = vld [vmem:[%s725_s5 + $0x8] sm:$0xff]  }
  0x13   :  { %466 = vmatprep.subr.bf16.mxu0 %v553_v1  ;;  %v105_v13 = vand.u32 %v518_v11, %v103_v12  ;;  %479 = vmatpush3.bf16.msra.mxu1 %v521_v17  ;;  %v523_v29 = vld [vmem:[%s725_s5] sm:$0xff]   ;;  %v526_v32 = vld [vmem:[%s727_s7 + $0x8] sm:$0xff]   ;;  %vm261_vm5 = vcmask 261120   ;;  %v527_v43 = vld [vmem:[%s727_s7 + $0x10] sm:$0xff]  }
  0x14   :  { %480 = vmatprep.subr.bf16.mxu1 %v553_v1  ;;  %v525_v31 = vld [vmem:[%s727_s7] sm:$0xff]   ;;  %v528_v44 = vld [vmem:[%s727_s7 + $0x18] sm:$0xff]   ;;  %s556_s7 = smov [#allocation2]  }
  0x15   :  { %v419_v33 = vld [vmem:[%s724_s4] ss:$0 sm:$0xff]  ;;  %s399_s28 = sshll.u32 %s556_s7, 4  ;;  %s400_s28 = int_to_ptr.vmem [resolvable:$true] %s399_s28 }
  0x16   :  { %467 = vmatpush3.bf16.msra.mxu0 %v517_v10  ;;  %v425_v45 = vld [vmem:[%s726_s6] ss:$0 sm:$0xff]  ;;  %s529_s6 = scalar_lea.vmem %s400_s28, 256  ;;  %p534_p1 = scmp.lt.s32.totalorder %s400_s28, %s400_s28 }
  0x17   :  { %468 = vmatprep.subr.bf16.mxu0 %v553_v1  ;;  %481 = vmatpush3.bf16.msra.mxu1 %v522_v18  ;;  %v429_v55 = vld [vmem:[%s728_s8] ss:$0 sm:$0xff]  ;;  %p530_p0 = scmp.ne.s32.totalorder %s400_s28, %s529_s6  ;;  %p535_p2 = scmp.lt.s32.totalorder %s529_s6, %s529_s6 }
  0x18   :  { %494 = vmatprep.subr.bf16.mxu1 %v553_v1 }
  0x19   :  { %p536_p3 = por %p535_p2, %p534_p1 }
  0x1a   :  { %469 = vmatpush3.bf16.msra.mxu0 %v105_v13 }
  0x1b   :  { %486 = vmatprep.subr.bf16.mxu0 %v553_v1  ;;  %p537_p4 = pnand %p536_p3, %p530_p0 }
  0x1d   :  { %471 = vmatmul.mubr.msk.bf16.vlgmr.msra.gmra.mrb[0].mxu0 %vm96_vm3, %v36_v16 }
  0x1e   :  { %490 = vmatprep.mubr.msk.bf16.mxu0 %vm554_vm0, %v553_v1  ;;  %487 = vmatpush3.bf16.msra.mxu0 %v523_v29 }
  0x1f   :  { %488 = vmatprep.subr.bf16.mxu0 %v553_v1 }
  0x22   :  { %489 = vmatpush3.bf16.msra.mxu0 %v524_v30 }
  0xf0   :  { %v141_v20 = vpop.f32.mrb[0].mxu0 }
  0xf1   :  { %v142_v21 = vadd.f32 %v410_v19, %v141_v20  ;;  %v472_v22 = vpop.f32.mrb[1].mxu0 }
  0xf2   :  { %v144_v23 = vpop.f32.mrb[2].mxu0 }
  0xf3   :  { %v145_v24 = vadd.f32 %v410_v19, %v144_v23  ;;  %v473_v25 = vpop.f32.mrb[3].mxu0  ;;  %v148_v26 = vmax.f32 %v142_v21, 0.0 }
  0xf5   :  { %v149_v27 = vmax.f32 %v145_v24, 0.0 }
  0xf7   :  { %v150_v28 = vpack.c.bf16 %v149_v27, %v148_v26 }
  0xf9   :  { %483 = vmatmul.mubr.msk.bf16.vlgmr.msra.gmra.mrb[0].mxu1 %vm190_vm4, %v150_v28 }
  0xfa   :  { %502 = vmatprep.mubr.msk.bf16.mxu1 %vm554_vm0, %v553_v1  ;;  %495 = vmatpush3.bf16.msra.mxu1 %v525_v31 }
  0xfb   :  { %496 = vmatprep.subr.bf16.mxu1 %v553_v1 }
  0xfe   :  { %497 = vmatpush3.bf16.msra.mxu1 %v526_v32 }
  0xff   :  { %498 = vmatprep.subr.bf16.mxu1 %v553_v1 }
 0x102   :  { %499 = vmatpush3.bf16.msra.mxu1 %v527_v43 }
 0x103   :  { %500 = vmatprep.subr.bf16.mxu1 %v553_v1 }
 0x106   :  { %501 = vmatpush3.bf16.msra.mxu1 %v528_v44 }
 0x1cc   :  { %v228_v34 = vpop.f32.mrb[0].mxu1 }
 0x1cd   :  { %v229_v35 = vadd.f32 %v419_v33, %v228_v34  ;;  %v484_v36 = vpop.f32.mrb[1].mxu1 }
 0x1ce   :  { %v231_v37 = vpop.f32.mrb[2].mxu1 }
 0x1cf   :  { %v232_v38 = vadd.f32 %v419_v33, %v231_v37  ;;  %v485_v39 = vpop.f32.mrb[3].mxu1  ;;  %v235_v40 = vmax.f32 %v229_v35, 0.0 }
 0x1d1   :  { %v236_v41 = vmax.f32 %v232_v38, 0.0 }
 0x1d3   :  { %v237_v42 = vpack.c.bf16 %v236_v41, %v235_v40 }
 0x1d5   :  { %491 = vmatmul.mubr.msk.bf16.vlgmr.msra.gmra.mrb[4].mxu0 %vm261_vm5, %v237_v42 }
 0x2a8   :  { %v299_v46 = vpop.f32.mrb[4].mxu0 }
 0x2a9   :  { %v300_v47 = vadd.f32 %v425_v45, %v299_v46  ;;  %v492_v48 = vpop.f32.mrb[5].mxu0 }
 0x2aa   :  { %v302_v49 = vpop.f32.mrb[6].mxu0 }
 0x2ab   :  { %v303_v50 = vadd.f32 %v425_v45, %v302_v49  ;;  %v493_v51 = vpop.f32.mrb[7].mxu0  ;;  %v306_v52 = vmax.f32 %v300_v47, 0.0 }
 0x2ad   :  { %v307_v53 = vmax.f32 %v303_v50, 0.0 }
 0x2af   :  { %v308_v54 = vpack.c.bf16 %v307_v53, %v306_v52 }
 0x2b1   :  { %503 = vmatmul.mubr.msk.bf16.vlgmr.msra.gmra.mrb[4].mxu1 %vm190_vm4, %v308_v54 }
 0x384   :  { %v385_v56 = vpop.f32.mrb[4].mxu1 }
 0x385   :  { %v386_v57 = vadd.f32 %v429_v55, %v385_v56  ;;  %v504_v58 = vpop.f32.mrb[5].mxu1 }
 0x386   :  { %v388_v59 = vpop.f32.mrb[6].mxu1 }
 0x387   :  { %392 = vst.msk [vmem:[#allocation2] sm:$0xff] %vm96_vm3, %v386_v57  ;;  %v389_v60 = vadd.f32 %v429_v55, %v388_v59  ;;  %v505_v61 = vpop.f32.mrb[7].mxu1 }
 0x389   :  { %393 = vst.msk [vmem:[#allocation2 + $0x8] sm:$0xff] %vm96_vm3, %v389_v60 }
 0x38a   :  { %540 = shalt.err (!%p537_p4)
}
 0x38b   :  { %s541_s30 = scalar_lea.hbm %s729_s9, 256 }
 0x38c   :  { %p542_p5 = scmp.ne.s32.totalorder %s729_s9, %s541_s30  ;;  %p545_p6 = scmp.lt.u32.totalorder %s541_s30, %s729_s9 }
 0x38e   :  { %p547_p7 = pnand %p545_p6, %p542_p5 }
 0x390   :  { %550 = shalt.err (!%p547_p7)
}
 0x391   :  { %s557_s12 = smov 128   ;;  %s558_s13 = smov 8  }
 0x392   :  { %405 = dma.vmem_to_hbm [thread:$0]  %s400_s28, 256, %s729_s9, [#allocation3], %s557_s12, %s557_s12, %s558_s13  }
 0x393   :  { %551 = dma.done.wait [#allocation3], 256  }
 0x394   :  { %552 = vsyncadd [#allocation3], 4294967040 }
 0x395   :  { %409 = vsyncpa [#allocation3], 1 }

</bundles_post_ra>
